<compile_context>
chip_gen: v5e
topology: v5e:2x2
jax: 0.10.0
libtpu: 0.0.40
codegen_flags: <defaults>
</compile_context>

<pallas_src>
import jax
import jax.numpy as jnp
from jax import lax
from jax.experimental import pallas as pl
from jax.experimental.pallas import tpu as pltpu

_NEG = -1e30  # finite "minus infinity" for padded vocab columns (avoids NaN in matmul)


def _round_up(x, m):
    return ((x + m - 1) // m) * m


def _bigram_logits_kernel(idx_ref, emb_ref, logits_ref):
    """Embedding lookup only (inference path).

    idx_ref    : (TILE_BT, 1)      int32  VMEM
    emb_ref    : (V_pad,  V_pad)   f32    VMEM (resident across grid)
    logits_ref : (TILE_BT, V_pad)  f32    VMEM (output tile)
    """
    tile_bt = idx_ref.shape[0]
    v_pad = emb_ref.shape[0]
    lane_iota = lax.broadcasted_iota(jnp.int32, (tile_bt, v_pad), 1)

    onehot_idx = (idx_ref[...] == lane_iota).astype(jnp.float32)
    logits_ref[...] = jnp.dot(onehot_idx, emb_ref[...],
                              preferred_element_type=jnp.float32)


def _bigram_logits_loss_kernel(idx_ref, tgt_ref, emb_ref, logits_ref, per_ex_ref):
    """Embedding lookup + per-example cross-entropy (training path).

    idx_ref    : (TILE_BT, 1)      int32  VMEM
    tgt_ref    : (TILE_BT, 1)      int32  VMEM
    emb_ref    : (V_pad,  V_pad)   f32    VMEM (resident across grid)
    logits_ref : (TILE_BT, V_pad)  f32    VMEM (output tile)
    per_ex_ref : (TILE_BT, 1)      f32    VMEM (output tile: per-example NLL)
    """
    tile_bt = idx_ref.shape[0]
    v_pad = emb_ref.shape[0]
    lane_iota = lax.broadcasted_iota(jnp.int32, (tile_bt, v_pad), 1)

    # Embedding lookup as one-hot matmul on the MXU:  (BT,V) @ (V,V) -> (BT,V).
    onehot_idx = (idx_ref[...] == lane_iota).astype(jnp.float32)
    logits = jnp.dot(onehot_idx, emb_ref[...], preferred_element_type=jnp.float32)
    logits_ref[...] = logits

    # Cross-entropy (padded columns hold _NEG so they do not affect max / logsumexp).
    m = jnp.max(logits, axis=-1, keepdims=True)                        # (TILE_BT, 1)
    lse = m + jnp.log(jnp.sum(jnp.exp(logits - m), axis=-1, keepdims=True))
    tgt_logit = jnp.sum(jnp.where(tgt_ref[...] == lane_iota, logits, 0.0),
                        axis=-1, keepdims=True)                        # (TILE_BT, 1)
    per_ex_ref[...] = lse - tgt_logit


def _pad_tokens(tok, bt, bt_pad):
    """(B,T) int -> (bt_pad, 1) int32 column (zero-padded tail rows)."""
    tok = tok.reshape(bt).astype(jnp.int32)
    if bt_pad != bt:
        tok = jnp.concatenate([tok, jnp.zeros((bt_pad - bt,), jnp.int32)])
    return tok[:, None]


def bigram_forward(emb_table, idx, targets=None, *, tile_bt_max=1024):
    """JAX wrapper replicating BigramModel.forward.

    emb_table : (V, V) f32
    idx       : (B, T) int
    targets   : (B, T) int or None
    Returns (logits, loss) with PyTorch-matching shapes:
      targets is None -> ((B, T, V), None)
      else            -> ((B*T, V), scalar mean cross-entropy)
    """
    B, T = idx.shape
    V = emb_table.shape[0]
    BT = B * T

    v_pad = _round_up(V, 128)
    tile_bt = min(tile_bt_max, _round_up(BT, 8))
    bt_pad = _round_up(BT, tile_bt)
    num_tiles = bt_pad // tile_bt

    # Pad embedding table to a lane-dense square. Padded vocab *columns* get a large
    # negative value (excluded from softmax); padded rows are never selected (idx < V).
    if v_pad == V:
        emb_pad = emb_table.astype(jnp.float32)
    else:
        emb_pad = jnp.full((v_pad, v_pad), _NEG, dtype=jnp.float32)
        emb_pad = emb_pad.at[:V, :V].set(emb_table.astype(jnp.float32))

    idx_flat = _pad_tokens(idx, BT, bt_pad)

    tok_spec = pl.BlockSpec((tile_bt, 1), lambda i: (i, 0))
    emb_spec = pl.BlockSpec((v_pad, v_pad), lambda i: (0, 0))      # VMEM-resident
    logits_spec = pl.BlockSpec((tile_bt, v_pad), lambda i: (i, 0))
    per_ex_spec = pl.BlockSpec((tile_bt, 1), lambda i: (i, 0))

    compiler_params = pltpu.CompilerParams(dimension_semantics=("parallel",))

    if targets is None:
        cost = pl.CostEstimate(
            flops=2 * bt_pad * v_pad * v_pad,
            transcendentals=0,
            bytes_accessed=bt_pad * 4 + v_pad * v_pad * 4 + bt_pad * v_pad * 4,
        )
        logits_pad = pl.pallas_call(
            _bigram_logits_kernel,
            out_shape=jax.ShapeDtypeStruct((bt_pad, v_pad), jnp.float32),
            grid=(num_tiles,),
            in_specs=[tok_spec, emb_spec],
            out_specs=logits_spec,
            compiler_params=compiler_params,
            cost_estimate=cost,
        )(idx_flat, emb_pad)
        logits = logits_pad if (bt_pad == BT and v_pad == V) else logits_pad[:BT, :V]
        return logits.reshape(B, T, V), None

    tgt_flat = _pad_tokens(targets, BT, bt_pad)

    cost = pl.CostEstimate(
        flops=2 * bt_pad * v_pad * v_pad,
        transcendentals=bt_pad * v_pad + bt_pad,
        bytes_accessed=(2 * bt_pad * 4 + v_pad * v_pad * 4
                        + bt_pad * v_pad * 4 + bt_pad * 4),
    )

    logits_pad, per_example = pl.pallas_call(
        _bigram_logits_loss_kernel,
        out_shape=(
            jax.ShapeDtypeStruct((bt_pad, v_pad), jnp.float32),
            jax.ShapeDtypeStruct((bt_pad, 1), jnp.float32),
        ),
        grid=(num_tiles,),
        in_specs=[tok_spec, tok_spec, emb_spec],
        out_specs=(logits_spec, per_ex_spec),
        compiler_params=compiler_params,
        cost_estimate=cost,
    )(idx_flat, tgt_flat, emb_pad)

    # Mean over the real (unpadded) B*T examples, matching F.cross_entropy default.
    loss = jnp.sum(per_example[:BT, 0]) / BT
    logits = logits_pad if (bt_pad == BT and v_pad == V) else logits_pad[:BT, :V]
    # PyTorch returns the (B*T, C) view of logits when targets are provided.
    return logits, loss


def _reference(emb_table, idx, targets):
    BT = idx.size
    logits = emb_table[idx.reshape(-1)]
    lse = jax.nn.logsumexp(logits, axis=-1)
    loss = jnp.mean(lse - logits[jnp.arange(BT), targets.reshape(-1)])
    return logits, loss


if __name__ == "__main__":
    vocab_size = 65  # tiny-Shakespeare-like vocab
    B, T = 2, 8

    key = jax.random.PRNGKey(0)
    k_emb, k_idx, k_tgt, k_idx2, k_tgt2, k_idx3, k_tgt3 = jax.random.split(key, 7)

    # nn.Embedding default init: N(0, 1)
    emb_table = jax.random.normal(k_emb, (vocab_size, vocab_size), dtype=jnp.float32)
    idx = jax.random.randint(k_idx, (B, T), 0, vocab_size, dtype=jnp.int32)
    targets = jax.random.randint(k_tgt, (B, T), 0, vocab_size, dtype=jnp.int32)

    # --- Training path (targets supplied) ---
    logits, loss = bigram_forward(emb_table, idx, targets)
    jax.block_until_ready((logits, loss))

    ref_logits, ref_loss = _reference(emb_table, idx, targets)
    assert logits.shape == (B * T, vocab_size)
    assert jnp.allclose(logits, ref_logits, atol=1e-5)
    assert jnp.allclose(loss, ref_loss, atol=1e-5)

    # --- Inference path (targets=None) ---
    logits_inf, loss_inf = bigram_forward(emb_table, idx)
    jax.block_until_ready(logits_inf)
    assert loss_inf is None
    assert logits_inf.shape == (B, T, vocab_size)
    assert jnp.allclose(logits_inf.reshape(B * T, vocab_size), ref_logits, atol=1e-5)

    # --- Multi-tile / padded-row path (exercises grid, row padding, parallel axis) ---
    B2, T2 = 4, 40  # BT=160 -> tile_bt=64, bt_pad=192, 3 grid steps
    idx2 = jax.random.randint(k_idx2, (B2, T2), 0, vocab_size, dtype=jnp.int32)
    tgt2 = jax.random.randint(k_tgt2, (B2, T2), 0, vocab_size, dtype=jnp.int32)
    logits2, loss2 = bigram_forward(emb_table, idx2, tgt2, tile_bt_max=64)
    jax.block_until_ready((logits2, loss2))
    ref_logits2, ref_loss2 = _reference(emb_table, idx2, tgt2)
    assert jnp.allclose(logits2, ref_logits2, atol=1e-5)
    assert jnp.allclose(loss2, ref_loss2, atol=1e-5)

    # --- Large-tile default path (single 1024-row tile, no padding of BT) ---
    B3, T3 = 8, 128  # BT=1024 -> tile_bt=1024, 1 grid step
    idx3 = jax.random.randint(k_idx3, (B3, T3), 0, vocab_size, dtype=jnp.int32)
    tgt3 = jax.random.randint(k_tgt3, (B3, T3), 0, vocab_size, dtype=jnp.int32)
    logits3, loss3 = bigram_forward(emb_table, idx3, tgt3)
    jax.block_until_ready((logits3, loss3))
    ref_logits3, ref_loss3 = _reference(emb_table, idx3, tgt3)
    assert jnp.allclose(logits3, ref_logits3, atol=1e-5)
    assert jnp.allclose(loss3, ref_loss3, atol=1e-5)

    print("KERNEL_OK")
</pallas_src>

<mosaic_0001>
module attributes {stable_mosaic.version = 11 : i64} {
  func.func @_bigram_logits_loss_kernel(%arg0: i32, %arg1: memref<16x1xi32, #tpu.memory_space<vmem>>, %arg2: memref<16x1xi32, #tpu.memory_space<vmem>>, %arg3: memref<128x128xf32, #tpu.memory_space<vmem>>, %arg4: memref<16x128xf32, #tpu.memory_space<vmem>>, %arg5: memref<16x1xf32, #tpu.memory_space<vmem>>) attributes {dimension_semantics = [#tpu.dimension_semantics<parallel>], iteration_bounds = array<i64: 1>, scalar_prefetch = 0 : i64, scratch_operands = 0 : i64, tpu.core_type = #tpu.core_type<tc>, window_params = [{transform_indices = @transform_0, window_bounds = array<i64: 16, 1>}, {transform_indices = @transform_1, window_bounds = array<i64: 16, 1>}, {pipeline_mode = #tpu.pipeline_mode<synchronous>, transform_indices = @transform_2, window_bounds = array<i64: 128, 128>}, {transform_indices = @transform_3, window_bounds = array<i64: 16, 128>}, {transform_indices = @transform_4, window_bounds = array<i64: 16, 1>}]} {
    %0 = tpu.iota {dimensions = array<i32: 1>} : vector<16x128xi32>
    %c0 = arith.constant 0 : index
    %c0_0 = arith.constant 0 : index
    %1 = vector.load %arg1[%c0, %c0_0] : memref<16x1xi32, #tpu.memory_space<vmem>>, vector<16x1xi32>
    %2 = vector.broadcast %1 : vector<16x1xi32> to vector<16x128xi32>
    %3 = arith.cmpi eq, %2, %0 : vector<16x128xi32>
    %4 = arith.extui %3 : vector<16x128xi1> to vector<16x128xi32>
    %5 = arith.sitofp %4 : vector<16x128xi32> to vector<16x128xf32>
    %c0_1 = arith.constant 0 : index
    %c0_2 = arith.constant 0 : index
    %6 = vector.load %arg3[%c0_1, %c0_2] : memref<128x128xf32, #tpu.memory_space<vmem>>, vector<128x128xf32>
    %cst = arith.constant dense<0.000000e+00> : vector<16x128xf32>
    %7 = tpu.matmul %5, %6, %cst {dimension_numbers = #tpu.dot_dimension_numbers<[1], [0], [0], [1], [0, 0, 1, 1], [], []>} : vector<16x128xf32>, vector<128x128xf32>, vector<16x128xf32> -> vector<16x128xf32>
    %c0_3 = arith.constant 0 : index
    %c0_4 = arith.constant 0 : index
    %8 = vector.load %arg4[%c0_3, %c0_4] : memref<16x128xf32, #tpu.memory_space<vmem>>, vector<16x128xf32>
    tpu.vector_store %arg4[%c0_3, %c0_4], %7 {strides = array<i32>} : memref<16x128xf32, #tpu.memory_space<vmem>>, vector<16x128xf32>,
    %cst_5 = arith.constant dense<0xFF800000> : vector<16xf32>
    %9 = vector.multi_reduction <maximumf>, %7, %cst_5 [1] : vector<16x128xf32> to vector<16xf32>
    %10 = vector.shape_cast %9 : vector<16xf32> to vector<16x1xf32>
    %11 = vector.broadcast %10 : vector<16x1xf32> to vector<16x128xf32>
    %12 = arith.subf %7, %11 : vector<16x128xf32>
    %13 = math.exp %12 : vector<16x128xf32>
    %cst_6 = arith.constant dense<0.000000e+00> : vector<16xf32>
    %14 = vector.multi_reduction <add>, %13, %cst_6 [1] : vector<16x128xf32> to vector<16xf32>
    %15 = vector.shape_cast %14 : vector<16xf32> to vector<16x1xf32>
    %16 = math.log %15 : vector<16x1xf32>
    %17 = arith.addf %10, %16 : vector<16x1xf32>
    %c0_7 = arith.constant 0 : index
    %c0_8 = arith.constant 0 : index
    %18 = vector.load %arg2[%c0_7, %c0_8] : memref<16x1xi32, #tpu.memory_space<vmem>>, vector<16x1xi32>
    %19 = vector.broadcast %18 : vector<16x1xi32> to vector<16x128xi32>
    %20 = arith.cmpi eq, %19, %0 : vector<16x128xi32>
    %cst_9 = arith.constant 0.000000e+00 : f32
    %21 = vector.broadcast %cst_9 : f32 to vector<16x128xf32>
    %22 = arith.select %20, %7, %21 : vector<16x128xi1>, vector<16x128xf32>
    %cst_10 = arith.constant dense<0.000000e+00> : vector<16xf32>
    %23 = vector.multi_reduction <add>, %22, %cst_10 [1] : vector<16x128xf32> to vector<16xf32>
    %24 = vector.shape_cast %23 : vector<16xf32> to vector<16x1xf32>
    %25 = arith.subf %17, %24 : vector<16x1xf32>
    %c0_11 = arith.constant 0 : index
    %c0_12 = arith.constant 0 : index
    %26 = vector.load %arg5[%c0_11, %c0_12] : memref<16x1xf32, #tpu.memory_space<vmem>>, vector<16x1xf32>
    tpu.vector_store %arg5[%c0_11, %c0_12], %25 {strides = array<i32>} : memref<16x1xf32, #tpu.memory_space<vmem>>, vector<16x1xf32>,
    return
  }
  func.func @transform_0(%arg0: i32) -> (i32, i32) {
    %c0_i32 = arith.constant 0 : i32
    %c0_i32_0 = arith.constant 0 : i32
    return %arg0, %c0_i32 : i32, i32
  }
  func.func @transform_1(%arg0: i32) -> (i32, i32) {
    %c0_i32 = arith.constant 0 : i32
    %c0_i32_0 = arith.constant 0 : i32
    return %arg0, %c0_i32 : i32, i32
  }
  func.func @transform_2(%arg0: i32) -> (i32, i32) {
    %c0_i32 = arith.constant 0 : i32
    %c0_i32_0 = arith.constant 0 : i32
    %c0_i32_1 = arith.constant 0 : i32
    return %c0_i32, %c0_i32_0 : i32, i32
  }
  func.func @transform_3(%arg0: i32) -> (i32, i32) {
    %c0_i32 = arith.constant 0 : i32
    %c0_i32_0 = arith.constant 0 : i32
    return %arg0, %c0_i32 : i32, i32
  }
  func.func @transform_4(%arg0: i32) -> (i32, i32) {
    %c0_i32 = arith.constant 0 : i32
    %c0_i32_0 = arith.constant 0 : i32
    return %arg0, %c0_i32 : i32, i32
  }
}

</mosaic_0001>

<bundles_post_ra>
// kernel: tpu_custom_call.1
= control target key start
LH: loop header
LB: loop body
LE: loop exit
PB: predicated region body
PF: predicated region fallthrough
CT: control target
= control target key end

     0   :  { %10 = vsyncpa [#allocation3], 0  ;;  %s303_s0 = inlined_call_operand.vmem [shape: s32[16,1], index: 0, kind: input, shape index: {}]   ;;  %s304_s1 = inlined_call_operand.vmem [shape: s32[16,1], index: 1, kind: input, shape index: {}]   ;;  %s305_s2 = inlined_call_operand.hbm [shape: f32[128,128], index: 2, kind: input, shape index: {}]   ;;  %s306_s3 = inlined_call_operand.hbm [shape: f32[16,128], index: 3, kind: output, shape index: {0}]   ;;  %s307_s4 = inlined_call_operand.vmem [shape: f32[16,1], index: 4, kind: output, shape index: {1}]  }
   0x1   :  { %11 = vsyncpa [#allocation4], 0  ;;  %s20_s17 = sshll.u32 %s305_s2, 4  ;;  %s242_s18 = smov [#allocation2]   ;;  %s21_s17 = int_to_ptr.hbm [resolvable:$true] %s20_s17 }
   0x2   :  { %s22_s19 = sshll.u32 %s242_s18, 4  ;;  %s243_s20 = smov 128   ;;  %s23_s19 = int_to_ptr.vmem [resolvable:$true] %s22_s19 }
   0x3   :  { %s244_s21 = smov 8  }
   0x4   :  { %28 = dma.hbm_to_vmem [thread:$0]  %s21_s17, 2048, %s23_s19, [#allocation3], %s243_s20, %s243_s20, %s244_s21  }
   0x5   :  { %238 = dma.done.wait [#allocation3], 2048  }
   0x6   :  { %239 = vsyncadd [#allocation3], 4294965248  ;;  %v245_v0 = vmov 0   ;;  %v35_v1 = vld [vmem:[%s303_s0] sm:$0xff]  ;;  %v64_v2 = vld [vmem:[#allocation2 + $0x78] sm:$0xff]  ;;  %v33_v21 = vlaneseq  ;;  %v246_v24 = vmov 1.0  }
   0x7   :  { %180 = vset.pattern.permute.xlu0 %v245_v0  ;;  %181 = vset.pattern.permute.xlu2 %v245_v0  ;;  %v63_v3 = vld [vmem:[#allocation2 + $0x70] sm:$0xff]  ;;  %v62_v4 = vld [vmem:[#allocation2 + $0x68] sm:$0xff]  ;;  %v61_v5 = vld [vmem:[#allocation2 + $0x60] sm:$0xff]  ;;  %s137_s5 = sshll.u32 %s306_s3, 4  ;;  %vm128_vm4 = vcmask 7168   ;;  %s138_s5 = int_to_ptr.hbm [resolvable:$true] %s137_s5 }
   0x8   :  { %38 = vperm.xlu0 %180, %v35_v1   ;;  %65 = vmatpush.msra.mxu0 %v64_v2  ;;  %v36_v6 = vld [vmem:[%s303_s0 + $0x8] sm:$0xff]  ;;  %v60_v7 = vld [vmem:[#allocation2 + $0x58] sm:$0xff]  ;;  %v59_v8 = vld [vmem:[#allocation2 + $0x50] sm:$0xff]  ;;  %v34_v22 = vand.u32 127, %v33_v21 }
   0x9   :  { %158 = vmatpush.msra.mxu1 %v64_v2  ;;  %v58_v9 = vld [vmem:[#allocation2 + $0x48] sm:$0xff]  ;;  %v57_v10 = vld [vmem:[#allocation2 + $0x40] sm:$0xff]  ;;  %v56_v11 = vld [vmem:[#allocation2 + $0x38] sm:$0xff] }
   0xa   :  { %66 = vmatpush.msra.mxu0 %v63_v3  ;;  %v55_v12 = vld [vmem:[#allocation2 + $0x30] sm:$0xff]  ;;  %v54_v13 = vld [vmem:[#allocation2 + $0x28] sm:$0xff]  ;;  %v53_v14 = vld [vmem:[#allocation2 + $0x20] sm:$0xff] }
   0xb   :  { %159 = vmatpush.msra.mxu1 %v63_v3  ;;  %v52_v15 = vld [vmem:[#allocation2 + $0x18] sm:$0xff]  ;;  %v51_v16 = vld [vmem:[#allocation2 + $0x10] sm:$0xff]  ;;  %v50_v17 = vld [vmem:[#allocation2 + $0x8] sm:$0xff] }
   0xc   :  { %67 = vmatpush.msra.mxu0 %v62_v4  ;;  %v49_v18 = vld [vmem:[#allocation2] sm:$0xff]  ;;  %v111_v20 = vld [vmem:[%s304_s1 + $0x8] sm:$0xff] }
   0xd   :  { %160 = vmatpush.msra.mxu1 %v62_v4  ;;  %v110_v19 = vld [vmem:[%s304_s1] sm:$0xff]  ;;  %s247_s1 = smov [#allocation5]  }
   0xe   :  { %68 = vmatpush.msra.mxu0 %v61_v5  ;;  %113 = vperm.xlu2 %181, %v110_v19   ;;  %s135_s28 = sshll.u32 %s247_s1, 4  ;;  %s136_s28 = int_to_ptr.vmem [resolvable:$true] %s135_s28 }
   0xf   :  { %161 = vmatpush.msra.mxu1 %v61_v5 }
  0x10   :  { %41 = vperm.xlu0 %180, %v36_v6   ;;  %69 = vmatpush.msra.mxu0 %v60_v7 }
  0x11   :  { %162 = vmatpush.msra.mxu1 %v60_v7 }
  0x12   :  { %70 = vmatpush.msra.mxu0 %v59_v8 }
  0x13   :  { %163 = vmatpush.msra.mxu1 %v59_v8 }
  0x14   :  { %71 = vmatpush.msra.mxu0 %v58_v9 }
  0x15   :  { %164 = vmatpush.msra.mxu1 %v58_v9 }
  0x16   :  { %72 = vmatpush.msra.mxu0 %v57_v10  ;;  %116 = vperm.xlu2 %181, %v111_v20  }
  0x17   :  { %165 = vmatpush.msra.mxu1 %v57_v10 }
  0x18   :  { %73 = vmatpush.msra.mxu0 %v56_v11 }
  0x19   :  { %166 = vmatpush.msra.mxu1 %v56_v11 }
  0x1a   :  { %74 = vmatpush.msra.mxu0 %v55_v12 }
  0x1b   :  { %167 = vmatpush.msra.mxu1 %v55_v12 }
  0x1c   :  { %75 = vmatpush.msra.mxu0 %v54_v13 }
  0x1d   :  { %168 = vmatpush.msra.mxu1 %v54_v13 }
  0x1e   :  { %76 = vmatpush.msra.mxu0 %v53_v14 }
  0x1f   :  { %169 = vmatpush.msra.mxu1 %v53_v14 }
  0x20   :  { %77 = vmatpush.msra.mxu0 %v52_v15 }
  0x21   :  { %170 = vmatpush.msra.mxu1 %v52_v15 }
  0x22   :  { %78 = vmatpush.msra.mxu0 %v51_v16 }
  0x23   :  { %171 = vmatpush.msra.mxu1 %v51_v16 }
  0x24   :  { %79 = vmatpush.msra.mxu0 %v50_v17 }
  0x25   :  { %172 = vmatpush.msra.mxu1 %v50_v17 }
  0x26   :  { %80 = vmatpush.msra.mxu0 %v49_v18 }
  0x27   :  { %173 = vmatpush.msra.mxu1 %v49_v18 }
  0x68   :  { %v114_v26 = vpop.permute.xlu2 %113 }
  0x69   :  { %vm118_vm2 = vcmp.eq.s32.totalorder %v114_v26, %v34_v22 }
  0x70   :  { %v117_v38 = vpop.permute.xlu2 %116 }
  0x71   :  { %vm119_vm3 = vcmp.eq.s32.totalorder %v117_v38, %v34_v22 }
  0x7a   :  { %v39_v23 = vpop.permute.xlu0 %38 }
  0x7b   :  { %vm43_vm0 = vcmp.eq.s32.totalorder %v39_v23, %v34_v22 }
  0x7c   :  { %156 = vmatmul.msk.f32.vlgmr.msra.gmra.mxu0 %vm43_vm0, %v246_v24 }
  0x82   :  { %v42_v25 = vpop.permute.xlu0 %41 }
  0x83   :  { %vm44_vm1 = vcmp.eq.s32.totalorder %v42_v25, %v34_v22 }
  0x84   :  { %157 = vmatmul.msk.f32.vlgmr.msra.gmra.mxu1 %vm44_vm1, %v246_v24 }
  0xf9   :  { %v82_v27 = vpop.f32.mrf.mxu0 }
  0xfa   :  { %88 = vst [vmem:[#allocation5] sm:$0xff] %v82_v27  ;;  %90 = vmax.xlane.f32.xlu1 %v82_v27  ;;  %v120_v28 = vsel %vm118_vm2, %v82_v27, 0.0 }
  0xfb   :  { %122 = vadd.xlane.f32.xlu2 %v120_v28 }
 0x101   :  { %v85_v29 = vpop.f32.mrf.mxu1 }
 0x102   :  { %89 = vst [vmem:[#allocation5 + $0x8] sm:$0xff] %v85_v29  ;;  %92 = vmax.xlane.f32.xlu1 %v85_v29  ;;  %v121_v39 = vsel %vm119_vm3, %v85_v29, 0.0 }
 0x103   :  { %143 = dma.vmem_to_hbm [thread:$0]  %s136_s28, 256, %s138_s5, [#allocation4], %s243_s20, %s243_s20, %s244_s21  }
 0x16d   :  { %v91_v30 = vpop.xlane.xlu1 %90 }
 0x16e   :  { %v94_v31 = vsub.f32 %v82_v27, %v91_v30  ;;  %v123_v45 = vpop.xlane.xlu2 %122 }
 0x170   :  { %v96_v32 = vmul.f32 1.442695, %v94_v31 }
 0x172   :  { %182 = vpow2.f32 %v96_v32 }
 0x175   :  { %v93_v33 = vpop.xlane.xlu1 %92 }
 0x176   :  { %v95_v34 = vsub.f32 %v85_v29, %v93_v33 }
 0x178   :  { %v183_v35 = vpop.eup %182  ;;  %v98_v36 = vmul.f32 1.442695, %v95_v34 }
 0x179   :  { %100 = vadd.xlane.f32.xlu0 %v183_v35 }
 0x17a   :  { %184 = vpow2.f32 %v98_v36 }
 0x180   :  { %v185_v37 = vpop.eup %184 }
 0x181   :  { %102 = vadd.xlane.f32.xlu1 %v185_v37 }
 0x189   :  { %124 = vadd.xlane.f32.xlu1 %v121_v39 }
 0x1ec   :  { %v101_v40 = vpop.xlane.xlu0 %100 }
 0x1ed   :  { %186 = vlog2.f32 %v101_v40 }
 0x1f3   :  { %v187_v41 = vpop.eup %186 }
 0x1f4   :  { %v105_v42 = vmul.f32 0.6931472, %v187_v41  ;;  %v103_v43 = vpop.xlane.xlu1 %102 }
 0x1f5   :  { %188 = vlog2.f32 %v103_v43 }
 0x1f6   :  { %v108_v44 = vadd.f32 %v105_v42, %v91_v30 }
 0x1f8   :  { %v126_v46 = vsub.f32 %v108_v44, %v123_v45 }
 0x1fa   :  { %129 = vst.msk [vmem:[%s307_s4] sm:$0xff] %vm128_vm4, %v126_v46 }
 0x1fb   :  { %v189_v47 = vpop.eup %188 }
 0x1fc   :  { %v107_v48 = vmul.f32 0.6931472, %v189_v47  ;;  %v125_v50 = vpop.xlane.xlu1 %124 }
 0x1fe   :  { %v109_v49 = vadd.f32 %v107_v48, %v93_v33 }
 0x200   :  { %v127_v51 = vsub.f32 %v109_v49, %v125_v50 }
 0x202   :  { %130 = vst.msk [vmem:[%s307_s4 + $0x8] sm:$0xff] %vm128_vm4, %v127_v51 }
 0x203   :  { %240 = dma.done.wait [#allocation4], 256  }
 0x204   :  { %241 = vsyncadd [#allocation4], 4294967040 }
 0x205   :  { %152 = vsyncpa [#allocation3], 1 }
 0x206   :  { %153 = vsyncpa [#allocation4], 1 }

</bundles_post_ra>
